<compile_context>
chip_gen: v5e
topology: v5e:2x2
jax: 0.10.0
libtpu: 0.0.40
codegen_flags: <defaults>
</compile_context>

<pallas_src>
import math
from functools import lru_cache

import jax
import jax.numpy as jnp
from jax import lax
from jax.experimental import pallas as pl
from jax.experimental.pallas import tpu as pltpu


_NEG_SLOPE = 0.5


def _leaky_relu(x, slope=_NEG_SLOPE):
    return jnp.where(x >= 0, x, slope * x)


def _round_up(x, m):
    return ((x + m - 1) // m) * m


@lru_cache(maxsize=1)
def _vmem_limit():
    """Scoped-VMEM budget: ~75% of physical (96 MiB v5e/v6e, 48 MiB v7x)."""
    try:
        cap = int(pltpu.get_tpu_info().vmem_capacity_bytes)
    except Exception:
        cap = 64 * 1024 * 1024
    return max(32 * 1024 * 1024, min((cap * 3) // 4, 100 * 1024 * 1024))


def _row_tile(n, bytes_per_row, *, target_bytes=1 << 20, max_rows=4096,
              align=128):
    """Row-tile size.

    - n <= 2*align: one full-extent block (exact dims are always legal).
    - otherwise: ~target_bytes worth of rows, `align`-aligned, capped at
      max_rows and at ceil(n/2) so the 'parallel' grid axis keeps >= 2 steps
      (v7x has 2 TensorCores per chip).
    """
    if n <= 2 * align:
        return n
    tile = min(max_rows, max(align, target_bytes // max(int(bytes_per_row), 1)))
    tile = max(align, (tile // align) * align)
    half = _round_up((n + 1) // 2, align)
    return min(tile, half)


# ---------------------------------------------------------------------------
# Kernels
# ---------------------------------------------------------------------------

def _feature_extract_kernel(x_ref, w_ref, o_ref):
    # LeakyReLU(x @ W) + x : MXU matmul (f32 accumulation) + VPU epilogue.
    x = x_ref[...]
    h = jnp.dot(x, w_ref[...], preferred_element_type=jnp.float32)
    o_ref[...] = (_leaky_relu(h) + x.astype(jnp.float32)).astype(o_ref.dtype)


def _pair_pred_kernel(x1_ref, x2_ref, w_ref, o_ref):
    # (featureExtract(e1) * featureExtract(e2)).sum(-1), emitted lane-dense
    # as a (1, tile) row so stores are wide vst (not 1-lane masked stores).
    w = w_ref[...]
    x1 = x1_ref[...]
    x2 = x2_ref[...]
    h1 = jnp.dot(x1, w, preferred_element_type=jnp.float32)
    h2 = jnp.dot(x2, w, preferred_element_type=jnp.float32)
    f1 = _leaky_relu(h1) + x1.astype(jnp.float32)
    f2 = _leaky_relu(h2) + x2.astype(jnp.float32)
    s = jnp.sum(f1 * f2, axis=-1)              # (tile,) -> lanes
    o_ref[...] = s[None, :].astype(o_ref.dtype)  # (1, tile)


def _cross_pred_fused_kernel(x1_ref, x2_ref, w_ref, o_ref):
    # featureExtract(e1)[i-tile] @ featureExtract(e2).T with e2 fully
    # VMEM-resident (constant index_map): e2 is read from HBM once and
    # featureExtract(e2) never round-trips through HBM. The per-i-tile
    # recompute of f2 is a few MFLOP (negligible vs. output writeback).
    in_dt = x1_ref.dtype
    w = w_ref[...]
    x1 = x1_ref[...]
    x2 = x2_ref[...]
    h1 = jnp.dot(x1, w, preferred_element_type=jnp.float32)
    f1 = (_leaky_relu(h1) + x1.astype(jnp.float32)).astype(in_dt)
    h2 = jnp.dot(x2, w, preferred_element_type=jnp.float32)
    f2 = (_leaky_relu(h2) + x2.astype(jnp.float32)).astype(in_dt)
    # Contract both operands on their last (lane) dim -- no explicit transpose.
    o_ref[...] = lax.dot_general(
        f1, f2, dimension_numbers=(((1,), (1,)), ((), ())),
        preferred_element_type=jnp.float32).astype(o_ref.dtype)


def _cross_pred_tiled_kernel(x1_ref, w_ref, f2_ref, o_ref, f1_scratch):
    # Fallback for very large e2: f2 tiles are pre-computed (one extra HBM
    # round-trip); f1 for the current i-tile is computed once (j == 0) into
    # VMEM scratch and reused across the inner j loop.
    @pl.when(pl.program_id(1) == 0)
    def _():
        x1 = x1_ref[...]
        h = jnp.dot(x1, w_ref[...], preferred_element_type=jnp.float32)
        f1_scratch[...] = (_leaky_relu(h) + x1.astype(jnp.float32)).astype(
            f1_scratch.dtype)

    o_ref[...] = lax.dot_general(
        f1_scratch[...], f2_ref[...],
        dimension_numbers=(((1,), (1,)), ((), ())),
        preferred_element_type=jnp.float32).astype(o_ref.dtype)


# ---------------------------------------------------------------------------
# Wrappers
# ---------------------------------------------------------------------------

def feature_extract(embeds, W):
    n, d = embeds.shape
    w = W.astype(embeds.dtype)
    itemsize = embeds.dtype.itemsize
    tn = _row_tile(n, d * itemsize)

    return pl.pallas_call(
        _feature_extract_kernel,
        out_shape=jax.ShapeDtypeStruct((n, d), embeds.dtype),
        grid=(pl.cdiv(n, tn),),
        in_specs=[
            pl.BlockSpec((tn, d), lambda i: (i, 0)),
            pl.BlockSpec((d, d), lambda i: (0, 0)),
        ],
        out_specs=pl.BlockSpec((tn, d), lambda i: (i, 0)),
        compiler_params=pltpu.CompilerParams(
            dimension_semantics=("parallel",),
            vmem_limit_bytes=_vmem_limit()),
    )(embeds, w)


def pair_pred(embeds1, embeds2, W):
    assert embeds1.shape == embeds2.shape
    n, d = embeds1.shape
    w = W.astype(embeds1.dtype)
    itemsize = embeds1.dtype.itemsize
    tn = _row_tile(n, 2 * d * itemsize)   # two row-tile inputs per step

    out = pl.pallas_call(
        _pair_pred_kernel,
        out_shape=jax.ShapeDtypeStruct((1, n), embeds1.dtype),
        grid=(pl.cdiv(n, tn),),
        in_specs=[
            pl.BlockSpec((tn, d), lambda i: (i, 0)),
            pl.BlockSpec((tn, d), lambda i: (i, 0)),
            pl.BlockSpec((d, d), lambda i: (0, 0)),
        ],
        out_specs=pl.BlockSpec((1, tn), lambda i: (0, i)),
        compiler_params=pltpu.CompilerParams(
            dimension_semantics=("parallel",),
            vmem_limit_bytes=_vmem_limit()),
    )(embeds1, embeds2, w)
    return out.reshape(n)


def cross_pred(embeds1, embeds2, W):
    n1, d = embeds1.shape
    n2, d2 = embeds2.shape
    assert d == d2
    dt = embeds1.dtype
    w = W.astype(dt)
    itemsize = dt.itemsize
    vmem_limit = _vmem_limit()
    budget = int(vmem_limit * 0.6)

    # VMEM needs of the fused path (e2 fully resident).
    x2_bytes = 2 * _round_up(max(n2, 1), 8) * d * itemsize   # double-buffered
    w_bytes = 2 * d * d * itemsize
    per_row = 2 * (n2 * itemsize + d * itemsize)             # out tile + x1 tile
    avail = budget - x2_bytes - w_bytes
    rows_fit = avail // per_row if avail > 0 else 0

    if rows_fit >= min(n1, 256):
        # ---- Fused path: no HBM round-trip for featureExtract(e2). ----
        if n1 <= 256:
            t1 = n1
        else:
            t1 = _row_tile(n1, per_row, target_bytes=2 << 20, max_rows=512)
            t1 = min(t1, max(128, (rows_fit // 128) * 128))
        return pl.pallas_call(
            _cross_pred_fused_kernel,
            out_shape=jax.ShapeDtypeStruct((n1, n2), dt),
            grid=(pl.cdiv(n1, t1),),
            in_specs=[
                pl.BlockSpec((t1, d), lambda i: (i, 0)),
                pl.BlockSpec((n2, d), lambda i: (0, 0)),   # e2 resident
                pl.BlockSpec((d, d), lambda i: (0, 0)),
            ],
            out_specs=pl.BlockSpec((t1, n2), lambda i: (i, 0)),
            compiler_params=pltpu.CompilerParams(
                dimension_semantics=("parallel",),
                vmem_limit_bytes=vmem_limit),
        )(embeds1, embeds2, w)

    # ---- Fallback: e2 too large to keep resident; pre-compute f2 once. ----
    f2 = feature_extract(embeds2, W)                       # (n2, d) in HBM
    t1 = _row_tile(n1, d * itemsize, target_bytes=1 << 20, max_rows=512)
    t2 = _row_tile(n2, d * itemsize, target_bytes=1 << 20, max_rows=512)
    return pl.pallas_call(
        _cross_pred_tiled_kernel,
        out_shape=jax.ShapeDtypeStruct((n1, n2), dt),
        grid=(pl.cdiv(n1, t1), pl.cdiv(n2, t2)),
        in_specs=[
            pl.BlockSpec((t1, d), lambda i, j: (i, 0)),
            pl.BlockSpec((d, d), lambda i, j: (0, 0)),
            pl.BlockSpec((t2, d), lambda i, j: (j, 0)),
        ],
        out_specs=pl.BlockSpec((t1, t2), lambda i, j: (i, j)),
        scratch_shapes=[pltpu.VMEM((t1, d), dt)],
        compiler_params=pltpu.CompilerParams(
            dimension_semantics=("parallel", "arbitrary"),
            vmem_limit_bytes=vmem_limit),
    )(embeds1, w, f2)


# ---------------------------------------------------------------------------
# Pure-JAX references for correctness checking
# ---------------------------------------------------------------------------

def _ref_feature_extract(e, W):
    h = e @ W
    return jnp.where(h >= 0, h, _NEG_SLOPE * h) + e


def _ref_pair_pred(e1, e2, W):
    return (_ref_feature_extract(e1, W) * _ref_feature_extract(e2, W)).sum(-1)


def _ref_cross_pred(e1, e2, W):
    return _ref_feature_extract(e1, W) @ _ref_feature_extract(e2, W).T


# ---------------------------------------------------------------------------
# Main
# ---------------------------------------------------------------------------

if __name__ == "__main__":
    EMBED = 32            # args.student_embed_size

    key = jax.random.PRNGKey(0)
    k_w, k_e1, k_e2, k_b1, k_b2 = jax.random.split(key, 5)

    # xavier_uniform init for W: U(-a, a), a = sqrt(6 / (fan_in + fan_out))
    bound = math.sqrt(6.0 / (EMBED + EMBED))
    W = jax.random.uniform(k_w, (EMBED, EMBED), jnp.float32, -bound, bound)

    # Small shapes (single-tile path)
    N1, N2 = 8, 16
    e1 = jax.random.normal(k_e1, (N1, EMBED), jnp.float32)
    e2 = jax.random.normal(k_e2, (N2, EMBED), jnp.float32)

    fe = jax.block_until_ready(feature_extract(e1, W))
    pp = jax.block_until_ready(pair_pred(e1, e2[:N1], W))
    cp = jax.block_until_ready(cross_pred(e1, e2, W))

    assert fe.shape == (N1, EMBED)
    assert pp.shape == (N1,)
    assert cp.shape == (N1, N2)
    assert jnp.allclose(fe, _ref_feature_extract(e1, W), atol=1e-5, rtol=1e-5)
    assert jnp.allclose(pp, _ref_pair_pred(e1, e2[:N1], W), atol=1e-4, rtol=1e-4)
    assert jnp.allclose(cp, _ref_cross_pred(e1, e2, W), atol=1e-3, rtol=1e-4)

    # Medium ragged shapes (multi-tile grids + masked ragged edges)
    N1b, N2b = 300, 200
    e1b = jax.random.normal(k_b1, (N1b, EMBED), jnp.float32)
    e2b = jax.random.normal(k_b2, (N1b, EMBED), jnp.float32)

    feb = jax.block_until_ready(feature_extract(e1b, W))
    ppb = jax.block_until_ready(pair_pred(e1b, e2b, W))
    cpb = jax.block_until_ready(cross_pred(e1b, e2b[:N2b], W))

    assert feb.shape == (N1b, EMBED)
    assert ppb.shape == (N1b,)
    assert cpb.shape == (N1b, N2b)
    assert jnp.allclose(feb, _ref_feature_extract(e1b, W), atol=1e-5, rtol=1e-5)
    assert jnp.allclose(ppb, _ref_pair_pred(e1b, e2b, W), atol=1e-4, rtol=1e-4)
    assert jnp.allclose(cpb, _ref_cross_pred(e1b, e2b[:N2b], W),
                        atol=1e-3, rtol=1e-4)

    print("KERNEL_OK")
</pallas_src>

<mosaic_0001>
module attributes {stable_mosaic.version = 11 : i64} {
  func.func @_feature_extract_kernel(%arg0: i32, %arg1: memref<8x32xf32, #tpu.memory_space<vmem>>, %arg2: memref<32x32xf32, #tpu.memory_space<vmem>>, %arg3: memref<8x32xf32, #tpu.memory_space<vmem>>) attributes {dimension_semantics = [#tpu.dimension_semantics<parallel>], iteration_bounds = array<i64: 1>, scalar_prefetch = 0 : i64, scratch_operands = 0 : i64, tpu.core_type = #tpu.core_type<tc>, window_params = [{transform_indices = @transform_0, window_bounds = array<i64: 8, 32>}, {pipeline_mode = #tpu.pipeline_mode<synchronous>, transform_indices = @transform_1, window_bounds = array<i64: 32, 32>}, {transform_indices = @transform_2, window_bounds = array<i64: 8, 32>}]} {
    %c0 = arith.constant 0 : index
    %c0_0 = arith.constant 0 : index
    %0 = vector.load %arg1[%c0, %c0_0] : memref<8x32xf32, #tpu.memory_space<vmem>>, vector<8x32xf32>
    %c0_1 = arith.constant 0 : index
    %c0_2 = arith.constant 0 : index
    %1 = vector.load %arg2[%c0_1, %c0_2] : memref<32x32xf32, #tpu.memory_space<vmem>>, vector<32x32xf32>
    %cst = arith.constant dense<0.000000e+00> : vector<8x32xf32>
    %2 = tpu.matmul %0, %1, %cst {dimension_numbers = #tpu.dot_dimension_numbers<[1], [0], [0], [1], [0, 0, 1, 1], [], []>} : vector<8x32xf32>, vector<32x32xf32>, vector<8x32xf32> -> vector<8x32xf32>
    %cst_3 = arith.constant 0.000000e+00 : f32
    %3 = vector.broadcast %cst_3 : f32 to vector<8x32xf32>
    %4 = arith.cmpf oge, %2, %3 : vector<8x32xf32>
    %cst_4 = arith.constant 5.000000e-01 : f32
    %5 = vector.broadcast %cst_4 : f32 to vector<8x32xf32>
    %6 = arith.mulf %5, %2 : vector<8x32xf32>
    %7 = arith.select %4, %2, %6 : vector<8x32xi1>, vector<8x32xf32>
    %8 = arith.addf %7, %0 : vector<8x32xf32>
    %c0_5 = arith.constant 0 : index
    %c0_6 = arith.constant 0 : index
    %9 = vector.load %arg3[%c0_5, %c0_6] : memref<8x32xf32, #tpu.memory_space<vmem>>, vector<8x32xf32>
    tpu.vector_store %arg3[%c0_5, %c0_6], %8 {strides = array<i32>} : memref<8x32xf32, #tpu.memory_space<vmem>>, vector<8x32xf32>,
    return
  }
  func.func @transform_0(%arg0: i32) -> (i32, i32) {
    %c0_i32 = arith.constant 0 : i32
    %c0_i32_0 = arith.constant 0 : i32
    return %arg0, %c0_i32 : i32, i32
  }
  func.func @transform_1(%arg0: i32) -> (i32, i32) {
    %c0_i32 = arith.constant 0 : i32
    %c0_i32_0 = arith.constant 0 : i32
    %c0_i32_1 = arith.constant 0 : i32
    return %c0_i32, %c0_i32_0 : i32, i32
  }
  func.func @transform_2(%arg0: i32) -> (i32, i32) {
    %c0_i32 = arith.constant 0 : i32
    %c0_i32_0 = arith.constant 0 : i32
    return %arg0, %c0_i32 : i32, i32
  }
}

</mosaic_0001>

<bundles_post_ra>
// kernel: tpu_custom_call.1
= control target key start
LH: loop header
LB: loop body
LE: loop exit
PB: predicated region body
PF: predicated region fallthrough
CT: control target
= control target key end

     0   :  { %7 = vsyncpa [#allocation3], 0  ;;  %s207_s0 = inlined_call_operand.hbm [shape: f32[8,32], index: 0, kind: input, shape index: {}]   ;;  %s208_s1 = inlined_call_operand.hbm [shape: f32[32,32], index: 1, kind: input, shape index: {}]   ;;  %s209_s2 = inlined_call_operand.hbm [shape: f32[8,32], index: 2, kind: output, shape index: {}]  }
   0x1   :  { %8 = vsyncpa [#allocation6], 0 }
   0x2   :  { %9 = vsyncpa [#allocation4], 0  ;;  %s15_s11 = sshll.u32 %s207_s0, 4  ;;  %s178_s12 = smov [#allocation2]   ;;  %s16_s11 = int_to_ptr.hbm [resolvable:$true] %s15_s11 }
   0x3   :  { %s17_s13 = sshll.u32 %s178_s12, 4  ;;  %s25_s16 = sshll.u32 %s208_s1, 4  ;;  %s18_s13 = int_to_ptr.vmem [resolvable:$true] %s17_s13  ;;  %s26_s16 = int_to_ptr.hbm [resolvable:$true] %s25_s16 }
   0x4   :  { %20 = dma.hbm_to_vmem [thread:$0]  %s16_s11, 128, %s18_s13, [#allocation3]  }
   0x5   :  { %s179_s17 = smov [#allocation5]   ;;  %s180_s19 = smov 128  }
   0x6   :  { %s27_s18 = sshll.u32 %s179_s17, 4  ;;  %s181_s20 = smov 8   ;;  %s28_s18 = int_to_ptr.vmem [resolvable:$true] %s27_s18 }
   0x7   :  { %33 = dma.hbm_to_vmem [thread:$0]  %s26_s16, 512, %s28_s18, [#allocation6], %s180_s19, %s180_s19, %s181_s20  }
   0x8   :  { %172 = dma.done.wait [#allocation3], 128  }
   0x9   :  { %173 = vsyncadd [#allocation3], 4294967168 }
   0xa   :  { %174 = dma.done.wait [#allocation6], 512  }
   0xb   :  { %175 = vsyncadd [#allocation6], 4294966784  ;;  %v46_v0 = vld [vmem:[#allocation5 + $0x18] sm:$0xff]  ;;  %v45_v1 = vld [vmem:[#allocation5 + $0x10] sm:$0xff]  ;;  %vm47_vm0 = vcmask 261120   ;;  %s182_s0 = smov [#allocation7]  }
   0xc   :  { %63 = vmatpush.msra.mxu0 %v46_v0  ;;  %v44_v2 = vld [vmem:[#allocation5 + $0x8] sm:$0xff]  ;;  %v43_v3 = vld [vmem:[#allocation5] sm:$0xff]  ;;  %v42_v4 = vld [vmem:[#allocation2] sm:$0xff]  ;;  %s81_s1 = sshll.u32 %s182_s0, 4  ;;  %s83_s23 = sshll.u32 %s209_s2, 4  ;;  %s82_s1 = int_to_ptr.vmem [resolvable:$true] %s81_s1  ;;  %s84_s23 = int_to_ptr.hbm [resolvable:$true] %s83_s23 }
   0xe   :  { %64 = vmatpush.msra.mxu0 %v45_v1 }
  0x10   :  { %65 = vmatpush.msra.mxu0 %v44_v2 }
  0x12   :  { %66 = vmatpush.msra.mxu0 %v43_v3 }
  0x13   :  { %94 = vmatmul.msk.f32.vlgmr.msra.gmra.mxu0 %vm47_vm0, %v42_v4 }
  0x90   :  { %v68_v5 = vpop.f32.mrf.mxu0 }
  0x91   :  { %vm71_vm1 = vcmp.ge.f32.partialorder %v68_v5, 0.0  ;;  %v72_v6 = vmul.f32 0.5, %v68_v5 }
  0x93   :  { %v73_v7 = vsel %vm71_vm1, %v68_v5, %v72_v6 }
  0x94   :  { %v74_v8 = vadd.f32 %v73_v7, %v42_v4 }
  0x96   :  { %75 = vst.msk [vmem:[#allocation7] sm:$0xff] %vm47_vm0, %v74_v8 }
  0x97   :  { %86 = dma.vmem_to_hbm [thread:$0]  %s82_s1, 128, %s84_s23, [#allocation4]  }
  0x98   :  { %176 = dma.done.wait [#allocation4], 128  }
  0x99   :  { %177 = vsyncadd [#allocation4], 4294967168 }
  0x9a   :  { %91 = vsyncpa [#allocation3], 1 }
  0x9b   :  { %92 = vsyncpa [#allocation6], 1 }
  0x9c   :  { %93 = vsyncpa [#allocation4], 1 }

</bundles_post_ra>
